<compile_context>
chip_gen: v7x
topology: tpu7x:2x2x1
jax: 0.10.0
libtpu: 0.0.40
codegen_flags: <defaults>
</compile_context>

<pallas_src>
import jax
import jax.numpy as jnp
from jax.experimental import pallas as pl
from jax.experimental.pallas import tpu as pltpu

LANE = 128
# 4096 rows * 128 lanes * 4 B = 2 MiB per f32 block (1 MiB for bf16).
DEFAULT_BLOCK_ROWS = 4096


def _mish_kernel(x_ref, o_ref):
    # Compute in f32 (required on v5e; cheap everywhere since we are mem-bound).
    x = x_ref[...].astype(jnp.float32)
    u = jnp.exp(-jnp.abs(x))          # u in (0, 1], never overflows
    u2 = u * u
    two_u = 2.0 * u
    pos = x >= 0.0
    # tanh(softplus(x)) as a rational function of u (single exp, no log/tanh):
    #   x >= 0: (1 + 2u) / (1 + 2u + 2u^2)
    #   x <  0: (u^2 + 2u) / (u^2 + 2u + 2)
    num = jnp.where(pos, 1.0 + two_u, u2 + two_u)
    den = num + jnp.where(pos, 2.0 * u2, 2.0)
    o_ref[...] = (x * num / den).astype(o_ref.dtype)


def mish_jit_pallas(x: jax.Array, block_rows: int = DEFAULT_BLOCK_ROWS) -> jax.Array:
    """mish(x) = x * tanh(softplus(x)), elementwise, any shape/dtype."""
    orig_shape = x.shape
    orig_dtype = x.dtype
    n = x.size
    if n == 0:
        return x

    x_flat = jnp.ravel(x)
    rem = n % LANE
    if rem != 0:
        # TODO(synk): could mask the ragged tail in-kernel (scalar-prefetch n)
        # to avoid this extra HBM copy; only hit when numel % 128 != 0.
        x_flat = jnp.pad(x_flat, (0, LANE - rem))
    rows = x_flat.size // LANE
    x2d = x_flat.reshape(rows, LANE)   # bitcast for contiguous input

    # Large tiles amortize per-step overhead; partial last block is masked by
    # Pallas (grid uses cdiv), so no row padding and no shrink loop.
    tile_rows = min(block_rows, rows)  # full-dim block is always legal
    grid = (pl.cdiv(rows, tile_rows),)

    out2d = pl.pallas_call(
        _mish_kernel,
        out_shape=jax.ShapeDtypeStruct((rows, LANE), orig_dtype),
        grid_spec=pltpu.PrefetchScalarGridSpec(
            num_scalar_prefetch=0,
            grid=grid,
            in_specs=[pl.BlockSpec((tile_rows, LANE), lambda i: (i, 0))],
            out_specs=pl.BlockSpec((tile_rows, LANE), lambda i: (i, 0)),
        ),
        compiler_params=pltpu.CompilerParams(
            dimension_semantics=("parallel",)),
    )(x2d)

    out_flat = out2d.reshape(-1)
    if rem != 0:
        out_flat = out_flat[:n]
    return out_flat.reshape(orig_shape)


def mish_ref(x):
    xf = x.astype(jnp.float32)
    return (xf * jnp.tanh(jax.nn.softplus(xf))).astype(x.dtype)


if __name__ == "__main__":
    key = jax.random.PRNGKey(0)

    # Main check: NCHW input, same shape/dtype as the PyTorch module would see.
    x = jax.random.normal(key, (2, 4, 16, 16), dtype=jnp.float32) * 3.0
    y = mish_jit_pallas(x)
    jax.block_until_ready(y)
    y_ref = mish_ref(x)
    assert y.shape == x.shape and y.dtype == x.dtype
    assert jnp.allclose(y, y_ref, atol=1e-5, rtol=1e-5)

    # Ragged (numel % 128 != 0) fallback path.
    k1, k2 = jax.random.split(key)
    x2 = jax.random.normal(k1, (3, 5, 7, 11), dtype=jnp.float32) * 4.0
    y2 = mish_jit_pallas(x2)
    jax.block_until_ready(y2)
    assert y2.shape == x2.shape and y2.dtype == x2.dtype
    assert jnp.allclose(y2, mish_ref(x2), atol=1e-5, rtol=1e-5)

    # bf16 path (compute in f32, cast out).
    x3 = (jax.random.normal(k2, (4, 8, 32), dtype=jnp.float32) * 3.0).astype(jnp.bfloat16)
    y3 = mish_jit_pallas(x3)
    jax.block_until_ready(y3)
    assert y3.shape == x3.shape and y3.dtype == x3.dtype
    assert jnp.allclose(y3.astype(jnp.float32), mish_ref(x3).astype(jnp.float32),
                        atol=2e-2, rtol=2e-2)

    print("KERNEL_OK")
</pallas_src>

<mosaic_0001>
module attributes {stable_mosaic.version = 11 : i64} {
  func.func @_mish_kernel(%arg0: i32, %arg1: memref<16x128xf32, #tpu.memory_space<vmem>>, %arg2: memref<16x128xf32, #tpu.memory_space<vmem>>) attributes {dimension_semantics = [#tpu.dimension_semantics<parallel>], iteration_bounds = array<i64: 1>, scalar_prefetch = 0 : i64, scratch_operands = 0 : i64, tpu.core_type = #tpu.core_type<tc>, window_params = [{transform_indices = @transform_0, window_bounds = array<i64: 16, 128>}, {transform_indices = @transform_1, window_bounds = array<i64: 16, 128>}]} {
    %c0 = arith.constant 0 : index
    %c0_0 = arith.constant 0 : index
    %0 = vector.load %arg1[%c0, %c0_0] : memref<16x128xf32, #tpu.memory_space<vmem>>, vector<16x128xf32>
    %1 = math.absf %0 : vector<16x128xf32>
    %cst = arith.constant 0.000000e+00 : f32
    %2 = vector.broadcast %cst : f32 to vector<16x128xf32>
    %3 = arith.subf %2, %1 : vector<16x128xf32>
    %4 = math.exp %3 : vector<16x128xf32>
    %5 = arith.mulf %4, %4 : vector<16x128xf32>
    %cst_1 = arith.constant 2.000000e+00 : f32
    %6 = vector.broadcast %cst_1 : f32 to vector<16x128xf32>
    %7 = arith.mulf %6, %4 : vector<16x128xf32>
    %cst_2 = arith.constant 0.000000e+00 : f32
    %8 = vector.broadcast %cst_2 : f32 to vector<16x128xf32>
    %9 = arith.cmpf oge, %0, %8 : vector<16x128xf32>
    %cst_3 = arith.constant 1.000000e+00 : f32
    %10 = vector.broadcast %cst_3 : f32 to vector<16x128xf32>
    %11 = arith.addf %10, %7 : vector<16x128xf32>
    %12 = arith.addf %5, %7 : vector<16x128xf32>
    %13 = arith.select %9, %11, %12 : vector<16x128xi1>, vector<16x128xf32>
    %cst_4 = arith.constant 2.000000e+00 : f32
    %14 = vector.broadcast %cst_4 : f32 to vector<16x128xf32>
    %15 = arith.mulf %14, %5 : vector<16x128xf32>
    %cst_5 = arith.constant 2.000000e+00 : f32
    %16 = vector.broadcast %cst_5 : f32 to vector<16x128xf32>
    %17 = arith.select %9, %15, %16 : vector<16x128xi1>, vector<16x128xf32>
    %18 = arith.addf %13, %17 : vector<16x128xf32>
    %19 = arith.mulf %0, %13 : vector<16x128xf32>
    %20 = arith.divf %19, %18 : vector<16x128xf32>
    %c0_6 = arith.constant 0 : index
    %c0_7 = arith.constant 0 : index
    %21 = vector.load %arg2[%c0_6, %c0_7] : memref<16x128xf32, #tpu.memory_space<vmem>>, vector<16x128xf32>
    tpu.vector_store %arg2[%c0_6, %c0_7], %20 {strides = array<i32>} : memref<16x128xf32, #tpu.memory_space<vmem>>, vector<16x128xf32>,
    return
  }
  func.func @transform_0(%arg0: i32) -> (i32, i32) {
    %c0_i32 = arith.constant 0 : i32
    %c0_i32_0 = arith.constant 0 : i32
    return %arg0, %c0_i32 : i32, i32
  }
  func.func @transform_1(%arg0: i32) -> (i32, i32) {
    %c0_i32 = arith.constant 0 : i32
    %c0_i32_0 = arith.constant 0 : i32
    return %arg0, %c0_i32 : i32, i32
  }
}

</mosaic_0001>

<bundles_post_ra>
// kernel: tpu_custom_call.1
= control target key start
LH: loop header
LB: loop body
LE: loop exit
PB: predicated region body
PF: predicated region fallthrough
CT: control target
= control target key end

     0   :  { %6 = vsyncpa [#allocation3], 0  ;;  %s180_s0 = inlined_call_operand.hbm [shape: f32[16,128], index: 0, kind: input, shape index: {}]   ;;  %s181_s1 = inlined_call_operand.hbm [shape: f32[16,128], index: 1, kind: output, shape index: {}]  }
   0x1   :  { %7 = vsyncpa [#allocation4], 0  ;;  %s136_s6 = smov [#allocation2]   ;;  %s88_s10 = scalar_lea.hbm %s180_s0, 256 }
   0x2   :  { %s13_s7 = sshll.u32 %s136_s6, 4  ;;  %p89_p0 = scmp.ne.s32.totalorder %s180_s0, %s88_s10  ;;  %s14_s7 = int_to_ptr.vmem [resolvable:$true] %s13_s7 }
   0x3   :  { %p92_p1 = scmp.lt.u32.totalorder %s88_s10, %s180_s0 }
   0x5   :  { %p94_p2 = pnand %p92_p1, %p89_p0 }
   0x7   :  { %97 = shalt.err (!%p94_p2)
}
   0x8   :  { %s98_s15 = scalar_lea.vmem %s14_s7, 256  ;;  %p103_p4 = scmp.lt.s32.totalorder %s14_s7, %s14_s7 }
   0x9   :  { %p99_p3 = scmp.ne.s32.totalorder %s14_s7, %s98_s15  ;;  %p104_p5 = scmp.lt.s32.totalorder %s98_s15, %s98_s15 }
   0xb   :  { %p105_p6 = por %p104_p5, %p103_p4 }
   0xd   :  { %p106_p7 = pnand %p105_p6, %p99_p3 }
   0xf   :  { %109 = shalt.err (!%p106_p7)
}
  0x10   :  { %s137_s16 = smov 128   ;;  %s138_s17 = smov 8  }
  0x11   :  { %19 = dma.hbm_to_vmem [thread:$0]  %s180_s0, 256, %s14_s7, [#allocation3], %s137_s16, %s137_s16, %s138_s17  }
  0x12   :  { %132 = dma.done.wait [#allocation3], 256  }
  0x13   :  { %133 = vsyncadd [#allocation3], 4294967040  ;;  %v23_v0 = vld [vmem:[#allocation2] sm:$0xff]  ;;  %v24_v1 = vld [vmem:[#allocation2 + $0x8] sm:$0xff]  ;;  %s139_s0 = smov [#allocation5]  }
  0x14   :  { %v25_v2 = vand.u32 2147483647, %v23_v0  ;;  %v26_v3 = vand.u32 2147483647, %v24_v1  ;;  %vm37_vm0 = vcmp.ge.f32.partialorder %v23_v0, 0.0  ;;  %vm38_vm1 = vcmp.ge.f32.partialorder %v24_v1, 0.0 }
  0x15   :  { %s64_s20 = sshll.u32 %s139_s0, 4  ;;  %s65_s20 = int_to_ptr.vmem [resolvable:$true] %s64_s20 }
  0x16   :  { %v27_v4 = vsub.f32 0.0, %v25_v2  ;;  %v28_v5 = vsub.f32 0.0, %v26_v3  ;;  %s110_s21 = scalar_lea.vmem %s65_s20, 256  ;;  %p115_p9 = scmp.lt.s32.totalorder %s65_s20, %s65_s20 }
  0x17   :  { %p111_p8 = scmp.ne.s32.totalorder %s65_s20, %s110_s21  ;;  %p116_p10 = scmp.lt.s32.totalorder %s110_s21, %s110_s21 }
  0x18   :  { %v29_v6 = vmul.f32 1.442695, %v27_v4  ;;  %v31_v7 = vmul.f32 1.442695, %v28_v5 }
  0x19   :  { %p117_p11 = por %p116_p10, %p115_p9 }
  0x1a   :  { %80 = vpow2.f32 %v29_v6 }
  0x1b   :  { %82 = vpow2.f32 %v31_v7  ;;  %p118_p12 = pnand %p117_p11, %p111_p8 }
  0x24   :  { %v81_v8 = vpop.eup %80 }
  0x25   :  { %v83_v9 = vpop.eup %82  ;;  %v33_v10 = vmul.f32 %v81_v8, %v81_v8  ;;  %v35_v11 = vmul.f32 2.0, %v81_v8 }
  0x26   :  { %v34_v12 = vmul.f32 %v83_v9, %v83_v9  ;;  %v36_v13 = vmul.f32 2.0, %v83_v9 }
  0x27   :  { %v39_v14 = vadd.f32 1.0, %v35_v11  ;;  %v41_v15 = vadd.f32 %v35_v11, %v33_v10  ;;  %v45_v16 = vmul.f32 2.0, %v33_v10 }
  0x28   :  { %v40_v17 = vadd.f32 1.0, %v36_v13  ;;  %v42_v18 = vadd.f32 %v36_v13, %v34_v12  ;;  %v46_v19 = vmul.f32 2.0, %v34_v12 }
  0x29   :  { %v43_v20 = vsel %vm37_vm0, %v39_v14, %v41_v15  ;;  %v47_v21 = vsel %vm37_vm0, %v45_v16, 2.0 }
  0x2a   :  { %v49_v22 = vadd.f32 %v47_v21, %v43_v20  ;;  %v44_v23 = vsel %vm38_vm1, %v40_v17, %v42_v18  ;;  %v48_v24 = vsel %vm38_vm1, %v46_v19, 2.0  ;;  %v51_v26 = vmul.f32 %v43_v20, %v23_v0 }
  0x2b   :  { %v50_v25 = vadd.f32 %v48_v24, %v44_v23  ;;  %v52_v27 = vmul.f32 %v44_v23, %v24_v1 }
  0x2c   :  { %84 = vrcp.f32 %v49_v22 }
  0x2d   :  { %86 = vrcp.f32 %v50_v25 }
  0x36   :  { %v85_v28 = vpop.eup %84 }
  0x37   :  { %v87_v29 = vpop.eup %86  ;;  %v54_v30 = vmul.f32 %v85_v28, %v51_v26 }
  0x38   :  { %v56_v31 = vmul.f32 %v87_v29, %v52_v27 }
  0x39   :  { %57 = vst [vmem:[#allocation5] sm:$0xff] %v54_v30 }
  0x3a   :  { %58 = vst [vmem:[#allocation5 + $0x8] sm:$0xff] %v56_v31 }
  0x3b   :  { %121 = shalt.err (!%p118_p12)
}
  0x3c   :  { %s122_s24 = scalar_lea.hbm %s181_s1, 256 }
  0x3d   :  { %p123_p13 = scmp.ne.s32.totalorder %s181_s1, %s122_s24  ;;  %p126_p0 = scmp.lt.u32.totalorder %s122_s24, %s181_s1 }
  0x3f   :  { %p128_p1 = pnand %p126_p0, %p123_p13 }
  0x41   :  { %131 = shalt.err (!%p128_p1)
}
  0x42   :  { %70 = dma.vmem_to_hbm [thread:$0]  %s65_s20, 256, %s181_s1, [#allocation4], %s137_s16, %s137_s16, %s138_s17  }
  0x43   :  { %134 = dma.done.wait [#allocation4], 256  }
  0x44   :  { %135 = vsyncadd [#allocation4], 4294967040 }
  0x45   :  { %74 = vsyncpa [#allocation3], 1 }
  0x46   :  { %75 = vsyncpa [#allocation4], 1 }

</bundles_post_ra>
